<compile_context>
chip_gen: v5e
topology: v5e:2x2
jax: 0.10.0
libtpu: 0.0.40
codegen_flags: <defaults>
</compile_context>

<pallas_src>
import functools
import math

import jax
import jax.numpy as jnp
from jax import lax
from jax.experimental import pallas as pl
from jax.experimental.pallas import tpu as pltpu


def _round_up(x: int, m: int) -> int:
    return ((x + m - 1) // m) * m


def _random_affine_kernel(seed_ref, scale_ref, min_ref, o_ref):
    """Counter-based uniform RNG + affine transform for one (TB, L) tile."""
    tb, lanes = o_ref.shape

    # Global flat element counter for this tile (unique across the whole grid,
    # so tiles are automatically decorrelated -- no per-tile reseed needed).
    base_row = pl.program_id(0) * tb
    row = lax.broadcasted_iota(jnp.int32, (tb, lanes), 0)
    col = lax.broadcasted_iota(jnp.int32, (tb, lanes), 1)
    cnt = ((base_row + row) * lanes + col).astype(jnp.uint32)

    # Mix the seed into the counter, then hash (lowbias32) -> 32 random bits.
    x = cnt + seed_ref[0].astype(jnp.uint32) * jnp.uint32(0x9E3779B9)
    x = x ^ (x >> 16)
    x = x * jnp.uint32(0x7FEB352D)
    x = x ^ (x >> 15)
    x = x * jnp.uint32(0x846CA68B)
    x = x ^ (x >> 16)

    # Top 24 bits -> uniform float32 in [0, 1).
    u = (x >> 8).astype(jnp.int32).astype(jnp.float32) * jnp.float32(1.0 / (1 << 24))

    # Affine transform; scale/min are (1, L) rows broadcast over sublanes.
    o_ref[...] = scale_ref[...] * u + min_ref[...]


@functools.partial(jax.jit, static_argnames=("input_dim",))
def random_forward(x, min_val, scale_val, seed, *, input_dim=1):
    """JAX/Pallas equivalent of Random.forward.

    Args:
      x:         input tensor (only its shape is used).
      min_val:   tensor of shape min.shape.
      scale_val: tensor of shape min.shape (= max - min).
      seed:      int32 scalar seed (explicit, per-call).
      input_dim: number of trailing dims of `x` to strip off.
    """
    batch_shape = x.shape[:-input_dim] if input_dim > 0 else x.shape
    out_dims = tuple(min_val.shape)

    B = math.prod(int(s) for s in batch_shape)
    D = math.prod(int(s) for s in out_dims)
    N = B * D

    if N == 0:
        return jnp.zeros(batch_shape + out_dims, dtype=jnp.float32)

    # Lane-dense flat layout: L lanes such that L % D == 0 and L % 128 == 0.
    # Flat element e maps to output dim e % D, so min/scale repeat every D
    # lanes and the same (1, L) row is valid for every output row.
    L = math.lcm(D, 128)
    reps = L // D

    R = -(-N // L)                                   # logical rows needed
    # Rows per tile: keep each f32 output tile around <= 2 MiB, multiple of 8.
    max_tb = max(8, ((2 * 1024 * 1024) // (L * 4)) // 8 * 8)
    TB = min(max_tb, _round_up(R, 8))
    Rp = _round_up(R, TB)
    num_tiles = Rp // TB

    min_row = jnp.tile(jnp.reshape(min_val.astype(jnp.float32), (1, D)), (1, reps))
    scale_row = jnp.tile(jnp.reshape(scale_val.astype(jnp.float32), (1, D)), (1, reps))
    seed_arr = jnp.reshape(jnp.asarray(seed, dtype=jnp.int32), (1,))

    out_padded = pl.pallas_call(
        _random_affine_kernel,
        out_shape=jax.ShapeDtypeStruct((Rp, L), jnp.float32),
        grid=(num_tiles,),
        in_specs=[
            pl.BlockSpec(memory_space=pltpu.SMEM),       # seed scalar
            pl.BlockSpec((1, L), lambda i: (0, 0)),      # scale row (broadcast)
            pl.BlockSpec((1, L), lambda i: (0, 0)),      # min row   (broadcast)
        ],
        out_specs=pl.BlockSpec((TB, L), lambda i: (i, 0)),
        compiler_params=pltpu.CompilerParams(
            dimension_semantics=("parallel",),           # shard tiles on v7x 2xTC
            vmem_limit_bytes=32 * 1024 * 1024,
        ),
        cost_estimate=pl.CostEstimate(
            flops=10 * Rp * L,
            transcendentals=0,
            bytes_accessed=Rp * L * 4 + 2 * L * 4 + 4,
        ),
    )(seed_arr, scale_row, min_row)

    out_flat = jnp.reshape(out_padded, (-1,))
    if Rp * L != N:                                   # drop tail padding only if any
        out_flat = out_flat[:N]
    return jnp.reshape(out_flat, batch_shape + out_dims)


if __name__ == "__main__":
    key = jax.random.PRNGKey(0)
    k1, k2 = jax.random.split(key)

    # Case 1: input (2, 4, 8), input_dim=1 -> batch (2, 4); min/max shape (3,).
    x = jax.random.normal(k1, (2, 4, 8), dtype=jnp.float32)
    min_val = jnp.array([-1.0, 0.0, 2.0], dtype=jnp.float32)
    max_val = jnp.array([1.0, 2.0, 5.0], dtype=jnp.float32)
    scale_val = max_val - min_val
    seed = jnp.int32(42)

    out = random_forward(x, min_val, scale_val, seed, input_dim=1)
    out = jax.block_until_ready(out)

    assert out.shape == (2, 4, 3), out.shape
    assert out.dtype == jnp.float32, out.dtype
    assert bool(jnp.all(out >= min_val[None, None, :])), "sample below min"
    assert bool(jnp.all(out < max_val[None, None, :])), "sample at/above max"
    assert float(jnp.std(out)) > 0.0, "degenerate (non-random) samples"

    # Case 2: input (5, 7, 6, 4), input_dim=2 -> batch (5, 7); min/max shape (2, 2).
    x2 = jax.random.normal(k2, (5, 7, 6, 4), dtype=jnp.float32)
    min2 = jnp.array([[0.0, -2.0], [1.0, 3.0]], dtype=jnp.float32)
    max2 = jnp.array([[1.0, 2.0], [4.0, 10.0]], dtype=jnp.float32)
    out2 = random_forward(x2, min2, max2 - min2, jnp.int32(7), input_dim=2)
    out2 = jax.block_until_ready(out2)

    assert out2.shape == (5, 7, 2, 2), out2.shape
    assert bool(jnp.all(out2 >= min2)), "case 2: sample below min"
    assert bool(jnp.all(out2 < max2)), "case 2: sample at/above max"
    assert float(jnp.std(out2)) > 0.0, "case 2: degenerate samples"

    # TODO(synk): PyTorch's torch.rand advances a global RNG state across calls;
    # here the caller must supply a fresh int32 seed per call instead.
    print("KERNEL_OK")
</pallas_src>

<mosaic_0001>
module attributes {stable_mosaic.version = 11 : i64} {
  func.func @_random_affine_kernel(%arg0: i32, %arg1: memref<1xi32, #tpu.memory_space<smem>>, %arg2: memref<1x384xf32, #tpu.memory_space<vmem>>, %arg3: memref<1x384xf32, #tpu.memory_space<vmem>>, %arg4: memref<8x384xf32, #tpu.memory_space<vmem>>) attributes {dimension_semantics = [#tpu.dimension_semantics<parallel>], iteration_bounds = array<i64: 1>, scalar_prefetch = 0 : i64, scratch_operands = 0 : i64, tpu.core_type = #tpu.core_type<tc>, window_params = [{transform_indices = @transform_0, window_bounds = array<i64: 1>}, {pipeline_mode = #tpu.pipeline_mode<synchronous>, transform_indices = @transform_1, window_bounds = array<i64: 1, 384>}, {pipeline_mode = #tpu.pipeline_mode<synchronous>, transform_indices = @transform_2, window_bounds = array<i64: 1, 384>}, {transform_indices = @transform_3, window_bounds = array<i64: 8, 384>}]} {
    %c8_i32 = arith.constant 8 : i32
    %0 = arith.muli %arg0, %c8_i32 : i32
    %1 = tpu.iota {dimensions = array<i32: 0>} : vector<8x384xi32>
    %2 = tpu.iota {dimensions = array<i32: 1>} : vector<8x384xi32>
    %3 = vector.broadcast %0 : i32 to vector<8x384xi32>
    %4 = arith.addi %3, %1 : vector<8x384xi32>
    %c384_i32 = arith.constant 384 : i32
    %5 = vector.broadcast %c384_i32 : i32 to vector<8x384xi32>
    %6 = arith.muli %4, %5 : vector<8x384xi32>
    %7 = arith.addi %6, %2 : vector<8x384xi32>
    %c0 = arith.constant 0 : index
    %8 = memref.load %arg1[%c0] : memref<1xi32, #tpu.memory_space<smem>>
    %c-1640531527_i32 = arith.constant -1640531527 : i32
    %9 = arith.muli %8, %c-1640531527_i32 : i32
    %10 = vector.broadcast %9 : i32 to vector<8x384xi32>
    %11 = arith.addi %7, %10 : vector<8x384xi32>
    %c16_i32 = arith.constant 16 : i32
    %12 = vector.broadcast %c16_i32 : i32 to vector<8x384xi32>
    %13 = arith.shrui %11, %12 : vector<8x384xi32>
    %14 = arith.xori %11, %13 : vector<8x384xi32>
    %c2146121005_i32 = arith.constant 2146121005 : i32
    %15 = vector.broadcast %c2146121005_i32 : i32 to vector<8x384xi32>
    %16 = arith.muli %14, %15 : vector<8x384xi32>
    %c15_i32 = arith.constant 15 : i32
    %17 = vector.broadcast %c15_i32 : i32 to vector<8x384xi32>
    %18 = arith.shrui %16, %17 : vector<8x384xi32>
    %19 = arith.xori %16, %18 : vector<8x384xi32>
    %c-2073254261_i32 = arith.constant -2073254261 : i32
    %20 = vector.broadcast %c-2073254261_i32 : i32 to vector<8x384xi32>
    %21 = arith.muli %19, %20 : vector<8x384xi32>
    %c16_i32_0 = arith.constant 16 : i32
    %22 = vector.broadcast %c16_i32_0 : i32 to vector<8x384xi32>
    %23 = arith.shrui %21, %22 : vector<8x384xi32>
    %24 = arith.xori %21, %23 : vector<8x384xi32>
    %c8_i32_1 = arith.constant 8 : i32
    %25 = vector.broadcast %c8_i32_1 : i32 to vector<8x384xi32>
    %26 = arith.shrui %24, %25 : vector<8x384xi32>
    %27 = arith.sitofp %26 : vector<8x384xi32> to vector<8x384xf32>
    %cst = arith.constant 5.96046448E-8 : f32
    %28 = vector.broadcast %cst : f32 to vector<8x384xf32>
    %29 = arith.mulf %27, %28 : vector<8x384xf32>
    %c0_2 = arith.constant 0 : index
    %c0_3 = arith.constant 0 : index
    %30 = vector.load %arg2[%c0_2, %c0_3] : memref<1x384xf32, #tpu.memory_space<vmem>>, vector<1x384xf32>
    %31 = vector.broadcast %30 : vector<1x384xf32> to vector<8x384xf32>
    %32 = arith.mulf %31, %29 : vector<8x384xf32>
    %c0_4 = arith.constant 0 : index
    %c0_5 = arith.constant 0 : index
    %33 = vector.load %arg3[%c0_4, %c0_5] : memref<1x384xf32, #tpu.memory_space<vmem>>, vector<1x384xf32>
    %34 = vector.broadcast %33 : vector<1x384xf32> to vector<8x384xf32>
    %35 = arith.addf %32, %34 : vector<8x384xf32>
    %c0_6 = arith.constant 0 : index
    %c0_7 = arith.constant 0 : index
    %36 = vector.load %arg4[%c0_6, %c0_7] : memref<8x384xf32, #tpu.memory_space<vmem>>, vector<8x384xf32>
    tpu.vector_store %arg4[%c0_6, %c0_7], %35 {strides = array<i32>} : memref<8x384xf32, #tpu.memory_space<vmem>>, vector<8x384xf32>,
    return
  }
  func.func @transform_0(%arg0: i32) -> i32 {
    %c0_i32 = arith.constant 0 : i32
    %c0_i32_0 = arith.constant 0 : i32
    return %c0_i32 : i32
  }
  func.func @transform_1(%arg0: i32) -> (i32, i32) {
    %c0_i32 = arith.constant 0 : i32
    %c0_i32_0 = arith.constant 0 : i32
    %c0_i32_1 = arith.constant 0 : i32
    return %c0_i32, %c0_i32_0 : i32, i32
  }
  func.func @transform_2(%arg0: i32) -> (i32, i32) {
    %c0_i32 = arith.constant 0 : i32
    %c0_i32_0 = arith.constant 0 : i32
    %c0_i32_1 = arith.constant 0 : i32
    return %c0_i32, %c0_i32_0 : i32, i32
  }
  func.func @transform_3(%arg0: i32) -> (i32, i32) {
    %c0_i32 = arith.constant 0 : i32
    %c0_i32_0 = arith.constant 0 : i32
    return %arg0, %c0_i32 : i32, i32
  }
}

</mosaic_0001>

<bundles_post_ra>
// kernel: random_forward.1
= control target key start
LH: loop header
LB: loop body
LE: loop exit
PB: predicated region body
PF: predicated region fallthrough
CT: control target
= control target key end

     0   :  { %v16_v0 = vlaneseq  ;;  %s134_s0 = inlined_call_operand.<no memory space> [shape: s32[1], index: 0, kind: input, shape index: {}]   ;;  %s135_s1 = inlined_call_operand.vmem [shape: f32[1,384], index: 1, kind: input, shape index: {}]   ;;  %s136_s2 = inlined_call_operand.vmem [shape: f32[1,384], index: 2, kind: input, shape index: {}]   ;;  %s137_s3 = inlined_call_operand.vmem [shape: f32[8,384], index: 3, kind: output, shape index: {}]  }
   0x1   :  { %s29_s14 = smul.u32 2654435769, %s134_s0  ;;  %v67_v35 = vld [vmem:[%s135_s1] sm:$0x7] }
   0x2   :  { %v17_v1 = vshrl.u32 %v16_v0, 7  ;;  %v19_v2 = vand.u32 127, %v16_v0  ;;  %v78_v39 = vld [vmem:[%s136_s2] sm:$0x7]  ;;  %v69_v42 = vperm.slane %v67_v35, 0  ;;  %v70_v43 = vperm.slane %v67_v35, 1 }
   0x3   :  { %v30_v6 = vstv %s29_s14  ;;  %v71_v47 = vperm.slane %v67_v35, 2  ;;  %v80_v48 = vperm.slane %v78_v39, 0  ;;  %v81_v49 = vperm.slane %v78_v39, 1 }
   0x4   :  { %v24_v3 = vmul.u32 384, %v17_v1  ;;  %v20_v4 = vadd.s32 128, %v19_v2  ;;  %v21_v5 = vadd.s32 256, %v19_v2  ;;  %v82_v53 = vperm.slane %v78_v39, 2 }
   0x6   :  { %v25_v7 = vadd.s32 %v24_v3, %v19_v2  ;;  %v26_v8 = vadd.s32 %v24_v3, %v20_v4  ;;  %v27_v9 = vadd.s32 %v24_v3, %v21_v5 }
   0x8   :  { %v31_v10 = vadd.s32 %v30_v6, %v25_v7  ;;  %v32_v11 = vadd.s32 %v30_v6, %v26_v8  ;;  %v33_v12 = vadd.s32 %v30_v6, %v27_v9 }
   0xa   :  { %v34_v13 = vshrl.u32 %v31_v10, 16  ;;  %v35_v14 = vshrl.u32 %v32_v11, 16  ;;  %v36_v15 = vshrl.u32 %v33_v12, 16 }
   0xc   :  { %v37_v16 = vxor.u32 %v34_v13, %v31_v10  ;;  %v38_v17 = vxor.u32 %v35_v14, %v32_v11  ;;  %v39_v18 = vxor.u32 %v36_v15, %v33_v12 }
   0xe   :  { %v40_v19 = vmul.u32 2146121005, %v37_v16  ;;  %v41_v20 = vmul.u32 2146121005, %v38_v17  ;;  %v42_v21 = vmul.u32 2146121005, %v39_v18 }
  0x10   :  { %v43_v22 = vshrl.u32 %v40_v19, 15  ;;  %v44_v23 = vshrl.u32 %v41_v20, 15  ;;  %v45_v24 = vshrl.u32 %v42_v21, 15 }
  0x12   :  { %v46_v25 = vxor.u32 %v43_v22, %v40_v19  ;;  %v47_v26 = vxor.u32 %v44_v23, %v41_v20  ;;  %v48_v27 = vxor.u32 %v45_v24, %v42_v21 }
  0x14   :  { %v49_v28 = vmul.u32 2221713035, %v46_v25  ;;  %v50_v29 = vmul.u32 2221713035, %v47_v26  ;;  %v51_v30 = vmul.u32 2221713035, %v48_v27 }
  0x16   :  { %v52_v31 = vshrl.u32 %v49_v28, 16  ;;  %v53_v32 = vshrl.u32 %v50_v29, 16  ;;  %v54_v33 = vshrl.u32 %v51_v30, 16 }
  0x18   :  { %v55_v34 = vxor.u32 %v52_v31, %v49_v28  ;;  %v56_v36 = vxor.u32 %v53_v32, %v50_v29  ;;  %v57_v37 = vxor.u32 %v54_v33, %v51_v30 }
  0x1a   :  { %v58_v38 = vshrl.u32 %v55_v34, 8  ;;  %v59_v40 = vshrl.u32 %v56_v36, 8  ;;  %v60_v41 = vshrl.u32 %v57_v37, 8 }
  0x1c   :  { %v61_v44 = vcvt.s32.f32 %v58_v38  ;;  %v62_v45 = vcvt.s32.f32 %v59_v40  ;;  %v63_v46 = vcvt.s32.f32 %v60_v41 }
  0x1e   :  { %v64_v50 = vmul.f32 5.9604645e-08, %v61_v44  ;;  %v65_v51 = vmul.f32 5.9604645e-08, %v62_v45  ;;  %v66_v52 = vmul.f32 5.9604645e-08, %v63_v46 }
  0x20   :  { %v75_v54 = vmul.f32 %v69_v42, %v64_v50  ;;  %v76_v55 = vmul.f32 %v70_v43, %v65_v51  ;;  %v77_v56 = vmul.f32 %v71_v47, %v66_v52 }
  0x22   :  { %v86_v57 = vadd.f32 %v80_v48, %v75_v54  ;;  %v87_v58 = vadd.f32 %v81_v49, %v76_v55  ;;  %v88_v59 = vadd.f32 %v82_v53, %v77_v56 }
  0x24   :  { %89 = vst [vmem:[%s137_s3] sm:$0xff] %v86_v57 }
  0x25   :  { %90 = vst [vmem:[%s137_s3 + $0x8] sm:$0xff] %v87_v58 }
  0x26   :  { %91 = vst [vmem:[%s137_s3 + $0x10] sm:$0xff] %v88_v59 }

</bundles_post_ra>
